<compile_context>
chip_gen: v5e
topology: v5e:2x2
jax: 0.10.0
libtpu: 0.0.40
codegen_flags: <defaults>
</compile_context>

<pallas_src>
import functools

import jax
import jax.numpy as jnp
from jax.experimental import pallas as pl
from jax.experimental.pallas import tpu as pltpu

_EPS = 1e-5  # torch.nn.InstanceNorm1d default eps


# ----------------------------------------------------------------------------
# Pallas kernel: full forward pass for one lane-block of Bt batch segments,
# folded into the lane axis as (channels, Lb) with Lb = Bt*T (padded to 128
# only in the single-block fallback).
# ----------------------------------------------------------------------------
def _cgau_kernel(x_ref, cond_ref, m1_ref, m2_ref, P_ref, Pt_ref,
                 w1_ref, b1_ref, w2_ref, b2_ref, wg_ref, bg_ref,
                 w4_ref, b4_ref, out_ref, skip_ref, *, T, K1, K4):
    f32 = jnp.float32
    cdt = w1_ref.dtype                         # MXU operand dtype (f32 or bf16)
    Lb = x_ref.shape[1]                        # folded lanes in this block
    H = wg_ref.shape[0] // 2
    inv_T = 1.0 / T

    x_f32 = x_ref[...].astype(f32)             # (F, Lb), kept f32 for residual
    x = x_f32 if cdt == f32 else x_f32.astype(cdt)
    cond = cond_ref[...].astype(cdt)           # (C, Lb)
    m1 = m1_ref[...]                           # (K1, Lb) per-tap validity masks
    m2 = m2_ref[...]                           # (K4, Lb)
    P = P_ref[...]                             # (Lb, Bt) segment pooling (0/1)
    Pt = Pt_ref[...]                           # (Bt, Lb) broadcast-back (0/1)

    def conv_same(inp, mask, w_flat_ref, b_ref, K):
        # torch Conv1d (cross-correlation), stride=1, dilation=1, 'same' pad.
        # im2col: per tap, lane-rotate (XLU) + hoisted 0/1 mask (zero padding
        # and segment-boundary isolation), stack along the contraction axis,
        # then ONE (O, K*I) @ (K*I, Lb) MXU matmul.
        pad = (K - 1) // 2
        pieces = []
        for k in range(K):
            off = k - pad                      # source time index = t + off
            if off == 0:
                pieces.append(inp)             # center tap needs no mask
            else:
                rolled = pltpu.roll(inp, (-off) % Lb, axis=1)
                pieces.append(rolled * mask[k:k + 1, :])
        stacked = jnp.concatenate(pieces, axis=0)            # (K*I, Lb)
        return jnp.dot(w_flat_ref[...], stacked,
                       preferred_element_type=f32) + b_ref[...]

    def inst_norm(y):
        # InstanceNorm1d (affine=False, biased var) per (segment, channel)
        # over the T real columns.  One pooling matmul for [y; y*y], one
        # broadcast-back matmul for [mean; rsqrt(var + eps)].
        O = y.shape[0]
        pooled = jnp.dot(jnp.concatenate([y, y * y], axis=0), P,
                         preferred_element_type=f32) * inv_T  # (2O, Bt)
        mean = pooled[:O]
        var = jnp.maximum(pooled[O:] - mean * mean, 0.0)
        inv = jax.lax.rsqrt(var + _EPS)
        bb = jnp.dot(jnp.concatenate([mean, inv], axis=0), Pt,
                     preferred_element_type=f32)              # (2O, Lb)
        return (y - bb[:O]) * bb[O:]

    # in_layer: ConvNorm(F -> 2H, k=K1, 'same') + InstanceNorm1d
    h = inst_norm(conv_same(x, m1, w1_ref, b1_ref, K1))       # (2H, Lb) f32

    # cond_layer: ConvNorm(C -> 2H, k=1) + ReLU
    c = jnp.maximum(jnp.dot(w2_ref[...], cond,
                            preferred_element_type=f32) + b2_ref[...], 0.0)

    s = h + c                                                 # (2H, Lb) f32
    s = s if cdt == f32 else s.astype(cdt)

    # conv_fuse: ConvNorm(2H -> 2H, k=1, groups=2) as two (H,H) matmuls
    a_t = jnp.dot(wg_ref[:H], s[:H], preferred_element_type=f32) + bg_ref[:H]
    a_s = jnp.dot(wg_ref[H:], s[H:], preferred_element_type=f32) + bg_ref[H:]
    gate = jnp.tanh(a_t) * jax.nn.sigmoid(a_s)                # (H, Lb) f32
    gate = gate if cdt == f32 else gate.astype(cdt)

    # out_layer: ConvNorm(H -> F, k=K4, 'same') + InstanceNorm1d
    skip = inst_norm(conv_same(gate, m2, w4_ref, b4_ref, K4)) # (F, Lb) f32

    skip_ref[...] = skip.astype(skip_ref.dtype)
    out_ref[...] = (x_f32 + skip).astype(out_ref.dtype)


# ----------------------------------------------------------------------------
# Wrapper: layout plumbing (tight batch folding, weight re-lay, hoisted
# constants) and pallas_call over batch blocks.
# ----------------------------------------------------------------------------
def _full_spec(arr):
    nd = arr.ndim
    return pl.BlockSpec(arr.shape, lambda i, _n=nd: (0,) * _n)


def _pick_blocking(B, T, F, C, H, K1, K4, budget_bytes=32 * 1024 * 1024):
    """Choose (Bt segments per block, Lb lanes per block).

    Prefers tight, lane-aligned blocks (Bt*T multiple of 128) whose f32
    working set fits a conservative VMEM budget (also safe on v7x's 64 MiB);
    among those, prefers an even grid count so both v7x TensorCores get equal
    work.  Otherwise falls back to a single block over the whole batch with
    only the TOTAL lane count padded to a multiple of 128.
    """
    per_col = 4 * (K1 * F + K4 * H + 14 * H + 6 * F + 3 * C + K1 + K4 + 16)
    aligned = [d for d in range(1, B + 1)
               if B % d == 0 and (d * T) % 128 == 0
               and d * T * per_col <= budget_bytes]
    if aligned:
        best = max(aligned)
        if B // best > 1:
            even = [d for d in aligned if (B // d) % 2 == 0]
            if even:
                best = max(even)
        return best, best * T
    # TODO(synk): for very large unaligned B*T this single-block fallback can
    # exceed VMEM; a per-segment-padded multi-block path would be needed.
    return B, ((B * T + 127) // 128) * 128


@functools.partial(jax.jit, static_argnames=("compute_dtype",))
def cond_gate_activation_unit(x, cond, params, compute_dtype=jnp.float32):
    w1, b1, w2, b2, wg, bg, w4, b4 = params
    B, Fdim, T = x.shape
    C = cond.shape[1]
    H2, _, K1 = w1.shape
    H = H2 // 2
    K4 = w4.shape[2]
    cdt = compute_dtype

    Bt, Lb = _pick_blocking(B, T, Fdim, C, H, K1, K4)
    grid = B // Bt
    L_total = grid * Lb

    # fold batch into the lane axis, tight-packed at stride T; pad only the
    # total lane count up to the block boundary
    def fold(a):
        ch = a.shape[1]
        a = jnp.transpose(a, (1, 0, 2)).reshape(ch, B * T)
        return jnp.pad(a, ((0, 0), (0, L_total - B * T)))

    xf, cf = fold(x), fold(cond)

    # hoisted per-block constants (identical for every grid step):
    j = jnp.arange(Lb)
    tmod = j % T
    valid = j < Bt * T

    def tap_mask(K):
        offs = jnp.arange(K) - (K - 1) // 2
        src = tmod[None, :] + offs[:, None]
        return ((src >= 0) & (src < T) & valid[None, :]).astype(cdt)

    m1 = tap_mask(K1)                                        # (K1, Lb)
    m2 = tap_mask(K4)                                        # (K4, Lb)
    seg = j // T
    bidx = jnp.arange(Bt)
    P = ((seg[:, None] == bidx[None, :]) &
         valid[:, None]).astype(jnp.float32)                 # (Lb, Bt)
    Pt = (seg[None, :] == bidx[:, None]).astype(jnp.float32) # (Bt, Lb)

    # weight plumbing: im2col-flattened conv weights, squeezed k=1 convs
    w1f = jnp.transpose(w1, (0, 2, 1)).reshape(H2, K1 * Fdim).astype(cdt)
    w4f = jnp.transpose(w4, (0, 2, 1)).reshape(Fdim, K4 * H).astype(cdt)
    w2s = w2[:, :, 0].astype(cdt)
    wgs = wg[:, :, 0].astype(cdt)
    b1c, b2c, bgc, b4c = (b.astype(jnp.float32)[:, None]
                          for b in (b1, b2, bg, b4))

    kernel = functools.partial(_cgau_kernel, T=T, K1=K1, K4=K4)

    def data_spec(ch):
        return pl.BlockSpec((ch, Lb), lambda i: (0, i))

    grid_spec = pltpu.PrefetchScalarGridSpec(
        num_scalar_prefetch=0,
        grid=(grid,),
        in_specs=[
            data_spec(Fdim),                  # x  (folded, lane-dense)
            data_spec(C),                     # cond
            _full_spec(m1), _full_spec(m2),   # hoisted tap masks
            _full_spec(P), _full_spec(Pt),    # hoisted segment pooling mats
            _full_spec(w1f), _full_spec(b1c),
            _full_spec(w2s), _full_spec(b2c),
            _full_spec(wgs), _full_spec(bgc),
            _full_spec(w4f), _full_spec(b4c),
        ],
        out_specs=[data_spec(Fdim), data_spec(Fdim)],
    )

    outf, skipf = pl.pallas_call(
        kernel,
        out_shape=(jax.ShapeDtypeStruct((Fdim, L_total), x.dtype),
                   jax.ShapeDtypeStruct((Fdim, L_total), x.dtype)),
        grid_spec=grid_spec,
        input_output_aliases={0: 0},          # residual output reuses x buffer
        compiler_params=pltpu.CompilerParams(
            dimension_semantics=("parallel",),
            # above the default scoped limit, still safely inside v7x's 64 MiB
            vmem_limit_bytes=56 * 1024 * 1024),
    )(xf, cf, m1, m2, P, Pt, w1f, b1c, w2s, b2c, wgs, bgc, w4f, b4c)

    def unfold(a):
        return jnp.transpose(a[:, :B * T].reshape(Fdim, B, T), (1, 0, 2))

    return unfold(outf), unfold(skipf)


# ----------------------------------------------------------------------------
# Pure-JAX reference (torch semantics) for validation.
# ----------------------------------------------------------------------------
def _conv1d_ref(x, w, b, pad, groups=1):
    B, Cin, T = x.shape
    O, _, K = w.shape
    xp = jnp.pad(x, ((0, 0), (0, 0), (pad, pad)))
    gin, gout = Cin // groups, O // groups
    outs = []
    for g in range(groups):
        xg = xp[:, g * gin:(g + 1) * gin]
        wg_ = w[g * gout:(g + 1) * gout]
        acc = jnp.zeros((B, gout, T), jnp.float32)
        for k in range(K):
            acc = acc + jnp.einsum('oi,bit->bot', wg_[:, :, k], xg[:, :, k:k + T])
        outs.append(acc)
    return jnp.concatenate(outs, axis=1) + b[None, :, None]


def _inorm_ref(y):
    m = y.mean(axis=2, keepdims=True)
    v = ((y - m) ** 2).mean(axis=2, keepdims=True)
    return (y - m) / jnp.sqrt(v + _EPS)


def ref_forward(x, cond, params):
    w1, b1, w2, b2, wg, bg, w4, b4 = params
    H = wg.shape[1]
    h = _inorm_ref(_conv1d_ref(x, w1, b1, (w1.shape[2] - 1) // 2))
    c = jax.nn.relu(_conv1d_ref(cond, w2, b2, 0))
    a = _conv1d_ref(h + c, wg, bg, 0, groups=2)
    gate = jnp.tanh(a[:, :H]) * jax.nn.sigmoid(a[:, H:])
    skip = _inorm_ref(_conv1d_ref(gate, w4, b4, (w4.shape[2] - 1) // 2))
    return x + skip, skip


# ----------------------------------------------------------------------------
def _xavier(key, shape, gain=1.0):
    fan_out = shape[0]
    fan_in = shape[1] * shape[2]
    limit = gain * (6.0 / (fan_in + fan_out)) ** 0.5
    return jax.random.uniform(key, shape, jnp.float32, -limit, limit)


if __name__ == "__main__":
    # batch, feature_dim, cond_dim, hidden_dim, time (small, module-consistent)
    B, F, C, H, T = 4, 8, 8, 16, 24
    K1, K4 = 5, 3

    key = jax.random.PRNGKey(0)
    ks = jax.random.split(key, 10)
    params = (
        _xavier(ks[0], (2 * H, F, K1)),                       # in_layer conv w
        0.05 * jax.random.normal(ks[1], (2 * H,), jnp.float32),
        _xavier(ks[2], (2 * H, C, 1)),                        # cond_layer conv w
        0.05 * jax.random.normal(ks[3], (2 * H,), jnp.float32),
        _xavier(ks[4], (2 * H, H, 1)),                        # conv_fuse (groups=2)
        0.05 * jax.random.normal(ks[5], (2 * H,), jnp.float32),
        _xavier(ks[6], (F, H, K4)),                           # out_layer conv w
        0.05 * jax.random.normal(ks[7], (F,), jnp.float32),
    )

    x = jax.random.normal(ks[8], (B, F, T), jnp.float32)
    cond = jax.random.normal(ks[9], (B, C, T), jnp.float32)

    out, skip = cond_gate_activation_unit(x, cond, params)
    jax.block_until_ready((out, skip))

    ref_out, ref_skip = ref_forward(x, cond, params)
    assert out.shape == (B, F, T) and skip.shape == (B, F, T)
    assert jnp.allclose(out, ref_out, rtol=1e-4, atol=1e-4), "output mismatch"
    assert jnp.allclose(skip, ref_skip, rtol=1e-4, atol=1e-4), "skip mismatch"

    # bfloat16 MXU-operand path: smoke-run + loose statistical sanity check
    out_bf, skip_bf = cond_gate_activation_unit(x, cond, params,
                                                compute_dtype=jnp.bfloat16)
    jax.block_until_ready((out_bf, skip_bf))
    assert bool(jnp.isfinite(out_bf).all()) and bool(jnp.isfinite(skip_bf).all())
    assert float(jnp.mean(jnp.abs(out_bf - ref_out))) < 0.15, "bf16 path drifted"

    print("KERNEL_OK")
</pallas_src>

<mosaic_0001>
module attributes {stable_mosaic.version = 11 : i64} {
  func.func @_cgau_kernel(%arg0: i32, %arg1: memref<8x128xf32, #tpu.memory_space<vmem>>, %arg2: memref<8x128xf32, #tpu.memory_space<vmem>>, %arg3: memref<5x128xf32, #tpu.memory_space<vmem>>, %arg4: memref<3x128xf32, #tpu.memory_space<vmem>>, %arg5: memref<128x4xf32, #tpu.memory_space<vmem>>, %arg6: memref<4x128xf32, #tpu.memory_space<vmem>>, %arg7: memref<32x40xf32, #tpu.memory_space<vmem>>, %arg8: memref<32x1xf32, #tpu.memory_space<vmem>>, %arg9: memref<32x8xf32, #tpu.memory_space<vmem>>, %arg10: memref<32x1xf32, #tpu.memory_space<vmem>>, %arg11: memref<32x16xf32, #tpu.memory_space<vmem>>, %arg12: memref<32x1xf32, #tpu.memory_space<vmem>>, %arg13: memref<8x48xf32, #tpu.memory_space<vmem>>, %arg14: memref<8x1xf32, #tpu.memory_space<vmem>>, %arg15: memref<8x128xf32, #tpu.memory_space<vmem>>, %arg16: memref<8x128xf32, #tpu.memory_space<vmem>>) attributes {dimension_semantics = [#tpu.dimension_semantics<parallel>], iteration_bounds = array<i64: 1>, scalar_prefetch = 0 : i64, scratch_operands = 0 : i64, tpu.core_type = #tpu.core_type<tc>, window_params = [{transform_indices = @transform_0, window_bounds = array<i64: 8, 128>}, {transform_indices = @transform_1, window_bounds = array<i64: 8, 128>}, {pipeline_mode = #tpu.pipeline_mode<synchronous>, transform_indices = @transform_2, window_bounds = array<i64: 5, 128>}, {pipeline_mode = #tpu.pipeline_mode<synchronous>, transform_indices = @transform_3, window_bounds = array<i64: 3, 128>}, {pipeline_mode = #tpu.pipeline_mode<synchronous>, transform_indices = @transform_4, window_bounds = array<i64: 128, 4>}, {pipeline_mode = #tpu.pipeline_mode<synchronous>, transform_indices = @transform_5, window_bounds = array<i64: 4, 128>}, {pipeline_mode = #tpu.pipeline_mode<synchronous>, transform_indices = @transform_6, window_bounds = array<i64: 32, 40>}, {pipeline_mode = #tpu.pipeline_mode<synchronous>, transform_indices = @transform_7, window_bounds = array<i64: 32, 1>}, {pipeline_mode = #tpu.pipeline_mode<synchronous>, transform_indices = @transform_8, window_bounds = array<i64: 32, 8>}, {pipeline_mode = #tpu.pipeline_mode<synchronous>, transform_indices = @transform_9, window_bounds = array<i64: 32, 1>}, {pipeline_mode = #tpu.pipeline_mode<synchronous>, transform_indices = @transform_10, window_bounds = array<i64: 32, 16>}, {pipeline_mode = #tpu.pipeline_mode<synchronous>, transform_indices = @transform_11, window_bounds = array<i64: 32, 1>}, {pipeline_mode = #tpu.pipeline_mode<synchronous>, transform_indices = @transform_12, window_bounds = array<i64: 8, 48>}, {pipeline_mode = #tpu.pipeline_mode<synchronous>, transform_indices = @transform_13, window_bounds = array<i64: 8, 1>}, {transform_indices = @transform_14, window_bounds = array<i64: 8, 128>}, {transform_indices = @transform_15, window_bounds = array<i64: 8, 128>}]} {
    %c0 = arith.constant 0 : index
    %c0_0 = arith.constant 0 : index
    %0 = vector.load %arg1[%c0, %c0_0] : memref<8x128xf32, #tpu.memory_space<vmem>>, vector<8x128xf32>
    %c0_1 = arith.constant 0 : index
    %c0_2 = arith.constant 0 : index
    %1 = vector.load %arg2[%c0_1, %c0_2] : memref<8x128xf32, #tpu.memory_space<vmem>>, vector<8x128xf32>
    %c0_3 = arith.constant 0 : index
    %c0_4 = arith.constant 0 : index
    %2 = vector.load %arg3[%c0_3, %c0_4] : memref<5x128xf32, #tpu.memory_space<vmem>>, vector<5x128xf32>
    %c0_5 = arith.constant 0 : index
    %c0_6 = arith.constant 0 : index
    %3 = vector.load %arg4[%c0_5, %c0_6] : memref<3x128xf32, #tpu.memory_space<vmem>>, vector<3x128xf32>
    %c0_7 = arith.constant 0 : index
    %c0_8 = arith.constant 0 : index
    %4 = vector.load %arg5[%c0_7, %c0_8] : memref<128x4xf32, #tpu.memory_space<vmem>>, vector<128x4xf32>
    %c0_9 = arith.constant 0 : index
    %c0_10 = arith.constant 0 : index
    %5 = vector.load %arg6[%c0_9, %c0_10] : memref<4x128xf32, #tpu.memory_space<vmem>>, vector<4x128xf32>
    %c2_i32 = arith.constant 2 : i32
    %6 = tpu.dynamic_rotate %0 by %c2_i32 dim 1 : vector<8x128xf32>, i32 -> vector<8x128xf32>
    %7 = vector.extract_strided_slice %2 {offsets = [0, 0], sizes = [1, 128], strides = [1, 1]} : vector<5x128xf32> to vector<1x128xf32>
    %8 = vector.broadcast %7 : vector<1x128xf32> to vector<8x128xf32>
    %9 = arith.mulf %6, %8 : vector<8x128xf32>
    %c1_i32 = arith.constant 1 : i32
    %10 = tpu.dynamic_rotate %0 by %c1_i32 dim 1 : vector<8x128xf32>, i32 -> vector<8x128xf32>
    %11 = vector.extract_strided_slice %2 {offsets = [1, 0], sizes = [1, 128], strides = [1, 1]} : vector<5x128xf32> to vector<1x128xf32>
    %12 = vector.broadcast %11 : vector<1x128xf32> to vector<8x128xf32>
    %13 = arith.mulf %10, %12 : vector<8x128xf32>
    %c127_i32 = arith.constant 127 : i32
    %14 = tpu.dynamic_rotate %0 by %c127_i32 dim 1 : vector<8x128xf32>, i32 -> vector<8x128xf32>
    %15 = vector.extract_strided_slice %2 {offsets = [3, 0], sizes = [1, 128], strides = [1, 1]} : vector<5x128xf32> to vector<1x128xf32>
    %16 = vector.broadcast %15 : vector<1x128xf32> to vector<8x128xf32>
    %17 = arith.mulf %14, %16 : vector<8x128xf32>
    %c126_i32 = arith.constant 126 : i32
    %18 = tpu.dynamic_rotate %0 by %c126_i32 dim 1 : vector<8x128xf32>, i32 -> vector<8x128xf32>
    %19 = vector.extract_strided_slice %2 {offsets = [4, 0], sizes = [1, 128], strides = [1, 1]} : vector<5x128xf32> to vector<1x128xf32>
    %20 = vector.broadcast %19 : vector<1x128xf32> to vector<8x128xf32>
    %21 = arith.mulf %18, %20 : vector<8x128xf32>
    %22 = tpu.concatenate %9, %13, %0, %17, %21 in 0 : vector<8x128xf32>, vector<8x128xf32>, vector<8x128xf32>, vector<8x128xf32>, vector<8x128xf32> -> vector<40x128xf32>
    %c0_11 = arith.constant 0 : index
    %c0_12 = arith.constant 0 : index
    %23 = vector.load %arg7[%c0_11, %c0_12] : memref<32x40xf32, #tpu.memory_space<vmem>>, vector<32x40xf32>
    %cst = arith.constant dense<0.000000e+00> : vector<32x128xf32>
    %24 = tpu.matmul %23, %22, %cst {dimension_numbers = #tpu.dot_dimension_numbers<[1], [0], [0], [1], [0, 0, 1, 1], [], []>} : vector<32x40xf32>, vector<40x128xf32>, vector<32x128xf32> -> vector<32x128xf32>
    %c0_13 = arith.constant 0 : index
    %c0_14 = arith.constant 0 : index
    %25 = vector.load %arg8[%c0_13, %c0_14] : memref<32x1xf32, #tpu.memory_space<vmem>>, vector<32x1xf32>
    %26 = vector.broadcast %25 : vector<32x1xf32> to vector<32x128xf32>
    %27 = arith.addf %24, %26 : vector<32x128xf32>
    %28 = arith.mulf %27, %27 : vector<32x128xf32>
    %29 = tpu.concatenate %27, %28 in 0 : vector<32x128xf32>, vector<32x128xf32> -> vector<64x128xf32>
    %cst_15 = arith.constant dense<0.000000e+00> : vector<64x4xf32>
    %30 = tpu.matmul %29, %4, %cst_15 {dimension_numbers = #tpu.dot_dimension_numbers<[1], [0], [0], [1], [0, 0, 1, 1], [], []>} : vector<64x128xf32>, vector<128x4xf32>, vector<64x4xf32> -> vector<64x4xf32>
    %cst_16 = arith.constant 0.0416666679 : f32
    %31 = vector.broadcast %cst_16 : f32 to vector<64x4xf32>
    %32 = arith.mulf %30, %31 : vector<64x4xf32>
    %33 = vector.extract_strided_slice %32 {offsets = [0, 0], sizes = [32, 4], strides = [1, 1]} : vector<64x4xf32> to vector<32x4xf32>
    %34 = vector.extract_strided_slice %32 {offsets = [32, 0], sizes = [32, 4], strides = [1, 1]} : vector<64x4xf32> to vector<32x4xf32>
    %35 = arith.mulf %33, %33 : vector<32x4xf32>
    %36 = arith.subf %34, %35 : vector<32x4xf32>
    %cst_17 = arith.constant 0.000000e+00 : f32
    %37 = vector.broadcast %cst_17 : f32 to vector<32x4xf32>
    %38 = arith.maximumf %36, %37 : vector<32x4xf32>
    %cst_18 = arith.constant 9.99999974E-6 : f32
    %39 = vector.broadcast %cst_18 : f32 to vector<32x4xf32>
    %40 = arith.addf %38, %39 : vector<32x4xf32>
    %41 = math.rsqrt %40 : vector<32x4xf32>
    %42 = tpu.concatenate %33, %41 in 0 : vector<32x4xf32>, vector<32x4xf32> -> vector<64x4xf32>
    %cst_19 = arith.constant dense<0.000000e+00> : vector<64x128xf32>
    %43 = tpu.matmul %42, %5, %cst_19 {dimension_numbers = #tpu.dot_dimension_numbers<[1], [0], [0], [1], [0, 0, 1, 1], [], []>} : vector<64x4xf32>, vector<4x128xf32>, vector<64x128xf32> -> vector<64x128xf32>
    %44 = vector.extract_strided_slice %43 {offsets = [0, 0], sizes = [32, 128], strides = [1, 1]} : vector<64x128xf32> to vector<32x128xf32>
    %45 = arith.subf %27, %44 : vector<32x128xf32>
    %46 = vector.extract_strided_slice %43 {offsets = [32, 0], sizes = [32, 128], strides = [1, 1]} : vector<64x128xf32> to vector<32x128xf32>
    %47 = arith.mulf %45, %46 : vector<32x128xf32>
    %c0_20 = arith.constant 0 : index
    %c0_21 = arith.constant 0 : index
    %48 = vector.load %arg9[%c0_20, %c0_21] : memref<32x8xf32, #tpu.memory_space<vmem>>, vector<32x8xf32>
    %cst_22 = arith.constant dense<0.000000e+00> : vector<32x128xf32>
    %49 = tpu.matmul %48, %1, %cst_22 {dimension_numbers = #tpu.dot_dimension_numbers<[1], [0], [0], [1], [0, 0, 1, 1], [], []>} : vector<32x8xf32>, vector<8x128xf32>, vector<32x128xf32> -> vector<32x128xf32>
    %c0_23 = arith.constant 0 : index
    %c0_24 = arith.constant 0 : index
    %50 = vector.load %arg10[%c0_23, %c0_24] : memref<32x1xf32, #tpu.memory_space<vmem>>, vector<32x1xf32>
    %51 = vector.broadcast %50 : vector<32x1xf32> to vector<32x128xf32>
    %52 = arith.addf %49, %51 : vector<32x128xf32>
    %cst_25 = arith.constant 0.000000e+00 : f32
    %53 = vector.broadcast %cst_25 : f32 to vector<32x128xf32>
    %54 = arith.maximumf %52, %53 : vector<32x128xf32>
    %55 = arith.addf %47, %54 : vector<32x128xf32>
    %c0_26 = arith.constant 0 : index
    %c0_27 = arith.constant 0 : index
    %56 = vector.load %arg11[%c0_26, %c0_27] : memref<32x16xf32, #tpu.memory_space<vmem>>, vector<16x16xf32>
    %57 = vector.extract_strided_slice %55 {offsets = [0, 0], sizes = [16, 128], strides = [1, 1]} : vector<32x128xf32> to vector<16x128xf32>
    %cst_28 = arith.constant dense<0.000000e+00> : vector<16x128xf32>
    %58 = tpu.matmul %56, %57, %cst_28 {dimension_numbers = #tpu.dot_dimension_numbers<[1], [0], [0], [1], [0, 0, 1, 1], [], []>} : vector<16x16xf32>, vector<16x128xf32>, vector<16x128xf32> -> vector<16x128xf32>
    %c0_29 = arith.constant 0 : index
    %c0_30 = arith.constant 0 : index
    %59 = vector.load %arg12[%c0_29, %c0_30] : memref<32x1xf32, #tpu.memory_space<vmem>>, vector<16x1xf32>
    %60 = vector.broadcast %59 : vector<16x1xf32> to vector<16x128xf32>
    %61 = arith.addf %58, %60 : vector<16x128xf32>
    %c16 = arith.constant 16 : index
    %c0_31 = arith.constant 0 : index
    %62 = vector.load %arg11[%c16, %c0_31] : memref<32x16xf32, #tpu.memory_space<vmem>>, vector<16x16xf32>
    %63 = vector.extract_strided_slice %55 {offsets = [16, 0], sizes = [16, 128], strides = [1, 1]} : vector<32x128xf32> to vector<16x128xf32>
    %cst_32 = arith.constant dense<0.000000e+00> : vector<16x128xf32>
    %64 = tpu.matmul %62, %63, %cst_32 {dimension_numbers = #tpu.dot_dimension_numbers<[1], [0], [0], [1], [0, 0, 1, 1], [], []>} : vector<16x16xf32>, vector<16x128xf32>, vector<16x128xf32> -> vector<16x128xf32>
    %c16_33 = arith.constant 16 : index
    %c0_34 = arith.constant 0 : index
    %65 = vector.load %arg12[%c16_33, %c0_34] : memref<32x1xf32, #tpu.memory_space<vmem>>, vector<16x1xf32>
    %66 = vector.broadcast %65 : vector<16x1xf32> to vector<16x128xf32>
    %67 = arith.addf %64, %66 : vector<16x128xf32>
    %68 = math.tanh %61 : vector<16x128xf32>
    %69 = arith.negf %67 : vector<16x128xf32>
    %70 = math.exp %69 : vector<16x128xf32>
    %cst_35 = arith.constant 1.000000e+00 : f32
    %71 = vector.broadcast %cst_35 : f32 to vector<16x128xf32>
    %72 = arith.addf %71, %70 : vector<16x128xf32>
    %73 = arith.divf %71, %72 : vector<16x128xf32>
    %74 = arith.mulf %68, %73 : vector<16x128xf32>
    %c1_i32_36 = arith.constant 1 : i32
    %75 = tpu.dynamic_rotate %74 by %c1_i32_36 dim 1 : vector<16x128xf32>, i32 -> vector<16x128xf32>
    %76 = vector.extract_strided_slice %3 {offsets = [0, 0], sizes = [1, 128], strides = [1, 1]} : vector<3x128xf32> to vector<1x128xf32>
    %77 = vector.broadcast %76 : vector<1x128xf32> to vector<16x128xf32>
    %78 = arith.mulf %75, %77 : vector<16x128xf32>
    %c127_i32_37 = arith.constant 127 : i32
    %79 = tpu.dynamic_rotate %74 by %c127_i32_37 dim 1 : vector<16x128xf32>, i32 -> vector<16x128xf32>
    %80 = vector.extract_strided_slice %3 {offsets = [2, 0], sizes = [1, 128], strides = [1, 1]} : vector<3x128xf32> to vector<1x128xf32>
    %81 = vector.broadcast %80 : vector<1x128xf32> to vector<16x128xf32>
    %82 = arith.mulf %79, %81 : vector<16x128xf32>
    %83 = tpu.concatenate %78, %74, %82 in 0 : vector<16x128xf32>, vector<16x128xf32>, vector<16x128xf32> -> vector<48x128xf32>
    %c0_38 = arith.constant 0 : index
    %c0_39 = arith.constant 0 : index
    %84 = vector.load %arg13[%c0_38, %c0_39] : memref<8x48xf32, #tpu.memory_space<vmem>>, vector<8x48xf32>
    %cst_40 = arith.constant dense<0.000000e+00> : vector<8x128xf32>
    %85 = tpu.matmul %84, %83, %cst_40 {dimension_numbers = #tpu.dot_dimension_numbers<[1], [0], [0], [1], [0, 0, 1, 1], [], []>} : vector<8x48xf32>, vector<48x128xf32>, vector<8x128xf32> -> vector<8x128xf32>
    %c0_41 = arith.constant 0 : index
    %c0_42 = arith.constant 0 : index
    %86 = vector.load %arg14[%c0_41, %c0_42] : memref<8x1xf32, #tpu.memory_space<vmem>>, vector<8x1xf32>
    %87 = vector.broadcast %86 : vector<8x1xf32> to vector<8x128xf32>
    %88 = arith.addf %85, %87 : vector<8x128xf32>
    %89 = arith.mulf %88, %88 : vector<8x128xf32>
    %90 = tpu.concatenate %88, %89 in 0 : vector<8x128xf32>, vector<8x128xf32> -> vector<16x128xf32>
    %cst_43 = arith.constant dense<0.000000e+00> : vector<16x4xf32>
    %91 = tpu.matmul %90, %4, %cst_43 {dimension_numbers = #tpu.dot_dimension_numbers<[1], [0], [0], [1], [0, 0, 1, 1], [], []>} : vector<16x128xf32>, vector<128x4xf32>, vector<16x4xf32> -> vector<16x4xf32>
    %cst_44 = arith.constant 0.0416666679 : f32
    %92 = vector.broadcast %cst_44 : f32 to vector<16x4xf32>
    %93 = arith.mulf %91, %92 : vector<16x4xf32>
    %94 = vector.extract_strided_slice %93 {offsets = [0, 0], sizes = [8, 4], strides = [1, 1]} : vector<16x4xf32> to vector<8x4xf32>
    %95 = vector.extract_strided_slice %93 {offsets = [8, 0], sizes = [8, 4], strides = [1, 1]} : vector<16x4xf32> to vector<8x4xf32>
    %96 = arith.mulf %94, %94 : vector<8x4xf32>
    %97 = arith.subf %95, %96 : vector<8x4xf32>
    %cst_45 = arith.constant 0.000000e+00 : f32
    %98 = vector.broadcast %cst_45 : f32 to vector<8x4xf32>
    %99 = arith.maximumf %97, %98 : vector<8x4xf32>
    %cst_46 = arith.constant 9.99999974E-6 : f32
    %100 = vector.broadcast %cst_46 : f32 to vector<8x4xf32>
    %101 = arith.addf %99, %100 : vector<8x4xf32>
    %102 = math.rsqrt %101 : vector<8x4xf32>
    %103 = tpu.concatenate %94, %102 in 0 : vector<8x4xf32>, vector<8x4xf32> -> vector<16x4xf32>
    %cst_47 = arith.constant dense<0.000000e+00> : vector<16x128xf32>
    %104 = tpu.matmul %103, %5, %cst_47 {dimension_numbers = #tpu.dot_dimension_numbers<[1], [0], [0], [1], [0, 0, 1, 1], [], []>} : vector<16x4xf32>, vector<4x128xf32>, vector<16x128xf32> -> vector<16x128xf32>
    %105 = vector.extract_strided_slice %104 {offsets = [0, 0], sizes = [8, 128], strides = [1, 1]} : vector<16x128xf32> to vector<8x128xf32>
    %106 = arith.subf %88, %105 : vector<8x128xf32>
    %107 = vector.extract_strided_slice %104 {offsets = [8, 0], sizes = [8, 128], strides = [1, 1]} : vector<16x128xf32> to vector<8x128xf32>
    %108 = arith.mulf %106, %107 : vector<8x128xf32>
    %c0_48 = arith.constant 0 : index
    %c0_49 = arith.constant 0 : index
    %109 = vector.load %arg16[%c0_48, %c0_49] : memref<8x128xf32, #tpu.memory_space<vmem>>, vector<8x128xf32>
    tpu.vector_store %arg16[%c0_48, %c0_49], %108 {strides = array<i32>} : memref<8x128xf32, #tpu.memory_space<vmem>>, vector<8x128xf32>,
    %110 = arith.addf %0, %108 : vector<8x128xf32>
    %c0_50 = arith.constant 0 : index
    %c0_51 = arith.constant 0 : index
    %111 = vector.load %arg15[%c0_50, %c0_51] : memref<8x128xf32, #tpu.memory_space<vmem>>, vector<8x128xf32>
    tpu.vector_store %arg15[%c0_50, %c0_51], %110 {strides = array<i32>} : memref<8x128xf32, #tpu.memory_space<vmem>>, vector<8x128xf32>,
    return
  }
  func.func @transform_0(%arg0: i32) -> (i32, i32) {
    %c0_i32 = arith.constant 0 : i32
    %c0_i32_0 = arith.constant 0 : i32
    return %c0_i32, %arg0 : i32, i32
  }
  func.func @transform_1(%arg0: i32) -> (i32, i32) {
    %c0_i32 = arith.constant 0 : i32
    %c0_i32_0 = arith.constant 0 : i32
    return %c0_i32, %arg0 : i32, i32
  }
  func.func @transform_2(%arg0: i32) -> (i32, i32) {
    %c0_i32 = arith.constant 0 : i32
    %c0_i32_0 = arith.constant 0 : i32
    %c0_i32_1 = arith.constant 0 : i32
    return %c0_i32, %c0_i32_0 : i32, i32
  }
  func.func @transform_3(%arg0: i32) -> (i32, i32) {
    %c0_i32 = arith.constant 0 : i32
    %c0_i32_0 = arith.constant 0 : i32
    %c0_i32_1 = arith.constant 0 : i32
    return %c0_i32, %c0_i32_0 : i32, i32
  }
  func.func @transform_4(%arg0: i32) -> (i32, i32) {
    %c0_i32 = arith.constant 0 : i32
    %c0_i32_0 = arith.constant 0 : i32
    %c0_i32_1 = arith.constant 0 : i32
    return %c0_i32, %c0_i32_0 : i32, i32
  }
  func.func @transform_5(%arg0: i32) -> (i32, i32) {
    %c0_i32 = arith.constant 0 : i32
    %c0_i32_0 = arith.constant 0 : i32
    %c0_i32_1 = arith.constant 0 : i32
    return %c0_i32, %c0_i32_0 : i32, i32
  }
  func.func @transform_6(%arg0: i32) -> (i32, i32) {
    %c0_i32 = arith.constant 0 : i32
    %c0_i32_0 = arith.constant 0 : i32
    %c0_i32_1 = arith.constant 0 : i32
    return %c0_i32, %c0_i32_0 : i32, i32
  }
  func.func @transform_7(%arg0: i32) -> (i32, i32) {
    %c0_i32 = arith.constant 0 : i32
    %c0_i32_0 = arith.constant 0 : i32
    %c0_i32_1 = arith.constant 0 : i32
    return %c0_i32, %c0_i32_0 : i32, i32
  }
  func.func @transform_8(%arg0: i32) -> (i32, i32) {
    %c0_i32 = arith.constant 0 : i32
    %c0_i32_0 = arith.constant 0 : i32
    %c0_i32_1 = arith.constant 0 : i32
    return %c0_i32, %c0_i32_0 : i32, i32
  }
  func.func @transform_9(%arg0: i32) -> (i32, i32) {
    %c0_i32 = arith.constant 0 : i32
    %c0_i32_0 = arith.constant 0 : i32
    %c0_i32_1 = arith.constant 0 : i32
    return %c0_i32, %c0_i32_0 : i32, i32
  }
  func.func @transform_10(%arg0: i32) -> (i32, i32) {
    %c0_i32 = arith.constant 0 : i32
    %c0_i32_0 = arith.constant 0 : i32
    %c0_i32_1 = arith.constant 0 : i32
    return %c0_i32, %c0_i32_0 : i32, i32
  }
  func.func @transform_11(%arg0: i32) -> (i32, i32) {
    %c0_i32 = arith.constant 0 : i32
    %c0_i32_0 = arith.constant 0 : i32
    %c0_i32_1 = arith.constant 0 : i32
    return %c0_i32, %c0_i32_0 : i32, i32
  }
  func.func @transform_12(%arg0: i32) -> (i32, i32) {
    %c0_i32 = arith.constant 0 : i32
    %c0_i32_0 = arith.constant 0 : i32
    %c0_i32_1 = arith.constant 0 : i32
    return %c0_i32, %c0_i32_0 : i32, i32
  }
  func.func @transform_13(%arg0: i32) -> (i32, i32) {
    %c0_i32 = arith.constant 0 : i32
    %c0_i32_0 = arith.constant 0 : i32
    %c0_i32_1 = arith.constant 0 : i32
    return %c0_i32, %c0_i32_0 : i32, i32
  }
  func.func @transform_14(%arg0: i32) -> (i32, i32) {
    %c0_i32 = arith.constant 0 : i32
    %c0_i32_0 = arith.constant 0 : i32
    return %c0_i32, %arg0 : i32, i32
  }
  func.func @transform_15(%arg0: i32) -> (i32, i32) {
    %c0_i32 = arith.constant 0 : i32
    %c0_i32_0 = arith.constant 0 : i32
    return %c0_i32, %arg0 : i32, i32
  }
}

</mosaic_0001>

<bundles_post_ra>
// kernel: cond_gate_activation_unit.1
= control target key start
LH: loop header
LB: loop body
LE: loop exit
PB: predicated region body
PF: predicated region fallthrough
CT: control target
= control target key end

     0   :  { %vm371_vm0 = vcmask 64512   ;;  %s734_s24 = smov 126   ;;  %s735_s25 = smov 1   ;;  %v738_v7 = vmov 0   ;;  %vm114_vm1 = vcmask 326656   ;;  %vm290_vm2 = vcmask 1043456   ;;  %s1028_s0 = inlined_call_operand.vmem [shape: f32[8,128], index: 0, kind: input, shape index: {}, may-alias: {0,14}]   ;;  %s1029_s1 = inlined_call_operand.vmem [shape: f32[8,128], index: 1, kind: input, shape index: {}]   ;;  %s1030_s8 = inlined_call_operand.vmem [shape: f32[32,8], index: 8, kind: input, shape index: {}]   ;;  %s1031_s7 = inlined_call_operand.vmem [shape: f32[32,1], index: 7, kind: input, shape index: {}]   ;;  %s1032_s2 = inlined_call_operand.vmem [shape: f32[5,128], index: 2, kind: input, shape index: {}]   ;;  %s1033_s9 = inlined_call_operand.vmem [shape: f32[32,1], index: 9, kind: input, shape index: {}]   ;;  %s1034_s11 = inlined_call_operand.vmem [shape: f32[32,1], index: 11, kind: input, shape index: {}]   ;;  %s1035_s6 = inlined_call_operand.vmem [shape: f32[32,40], index: 6, kind: input, shape index: {}]   ;;  %s1036_s4 = inlined_call_operand.vmem [shape: f32[128,4], index: 4, kind: input, shape index: {}]   ;;  %s1037_s5 = inlined_call_operand.vmem [shape: f32[4,128], index: 5, kind: input, shape index: {}]   ;;  %s1038_s10 = inlined_call_operand.vmem [shape: f32[32,16], index: 10, kind: input, shape index: {}]   ;;  %s1039_s13 = inlined_call_operand.vmem [shape: f32[8,1], index: 13, kind: input, shape index: {}]   ;;  %s1040_s3 = inlined_call_operand.vmem [shape: f32[3,128], index: 3, kind: input, shape index: {}]   ;;  %s1041_s12 = inlined_call_operand.vmem [shape: f32[8,48], index: 12, kind: input, shape index: {}]   ;;  %s1042_s15 = inlined_call_operand.vmem [shape: f32[8,128], index: 15, kind: output, shape index: {1}]   ;;  %s1043_s14 = inlined_call_operand.vmem [shape: f32[8,128], index: 14, kind: output, shape index: {0}, may-alias: {0,14}]  }
   0x1   :  { %v822_v0 = vld [vmem:[%s1028_s0] sm:$0xff]  ;;  %v344_v3 = vld [vmem:[%s1030_s8 + $0x8] sm:$0xff]  ;;  %s737_s27 = smov 2   ;;  %v345_v4 = vld [vmem:[%s1030_s8 + $0x10] sm:$0xff]  ;;  %709 = vset.pattern.permute.xlu2 %v738_v7  ;;  %711 = vset.pattern.permute.xlu1 %v738_v7  ;;  %vm265_vm3 = vcmask 31744  }
   0x2   :  { %v50_v1 = vld [vmem:[%s1029_s1] sm:$0xff]  ;;  %82 = vrot.lane.b32.xlu0 %v822_v0, %s734_s24  ;;  %74 = vrot.lane.b32.xlu1 %v822_v0, %s735_s25  ;;  %s736_s1 = smov 127   ;;  %v346_v5 = vld [vmem:[%s1030_s8 + $0x18] sm:$0xff] }
   0x3   :  { %v343_v2 = vld [vmem:[%s1030_s8] sm:$0xff]  ;;  %399 = vmatpush.msra.mxu3 %v50_v1  ;;  %710 = vset.pattern.permute.xlu0 %v738_v7  ;;  %v91_v9 = vld [vmem:[%s1031_s7 + $0x8] sm:$0xff]  ;;  %v93_v10 = vld [vmem:[%s1031_s7 + $0x18] sm:$0xff] }
   0x4   :  { %690 = vmatmul.msk.f32.vlgmr.msra.gmra.mxu3 %vm371_vm0, %v343_v2  ;;  %v90_v6 = vld [vmem:[%s1031_s7] sm:$0xff]  ;;  %v92_v11 = vld [vmem:[%s1031_s7 + $0x10] sm:$0xff]  ;;  %v350_v16 = vld [vmem:[%s1033_s9 + $0x18] sm:$0xff] }
   0x5   :  { %96 = vperm.xlu2 %709, %v90_v6   ;;  %v51_v8 = vld [vmem:[%s1032_s2] sm:$0x1f]  ;;  %v349_v17 = vld [vmem:[%s1033_s9 + $0x10] sm:$0xff]  ;;  %v348_v25 = vld [vmem:[%s1033_s9 + $0x8] sm:$0xff] }
   0x6   :  { %v84_v12 = vperm.slane %v51_v8, 4  ;;  %v347_v18 = vld [vmem:[%s1033_s9] sm:$0xff]  ;;  %v80_v19 = vperm.slane %v51_v8, 3  ;;  %v76_v21 = vperm.slane %v51_v8, 1  ;;  %v72_v23 = vperm.slane %v51_v8, 0  ;;  %v468_v26 = vld [vmem:[%s1034_s11 + $0x18] sm:$0xff] }
   0x7   :  { %v424_v27 = vld [vmem:[%s1034_s11 + $0x8] sm:$0xff]  ;;  %v86_v30 = vld [vmem:[%s1035_s6] sm:$0xff]  ;;  %v467_v32 = vld [vmem:[%s1034_s11 + $0x10] sm:$0xff] }
   0x8   :  { %v423_v31 = vld [vmem:[%s1034_s11] sm:$0xff]  ;;  %v87_v33 = vld [vmem:[%s1035_s6 + $0x8] sm:$0xff]  ;;  %v88_v34 = vld [vmem:[%s1035_s6 + $0x10] sm:$0xff] }
   0x9   :  { %v89_v35 = vld [vmem:[%s1035_s6 + $0x18] sm:$0xff]  ;;  %v67_v37 = vld [vmem:[%s1036_s4 + $0x70] sm:$0xff]  ;;  %v66_v38 = vld [vmem:[%s1036_s4 + $0x68] sm:$0xff] }
   0xa   :  { %78 = vrot.lane.b32.xlu0 %v822_v0, %s736_s1  ;;  %70 = vrot.lane.b32.xlu1 %v822_v0, %s737_s27  ;;  %v68_v36 = vld [vmem:[%s1036_s4 + $0x78] sm:$0xff]  ;;  %v65_v39 = vld [vmem:[%s1036_s4 + $0x60] sm:$0xff] }
   0xb   :  { %160 = vmatpush.msra.mxu1 %v68_v36  ;;  %v64_v40 = vld [vmem:[%s1036_s4 + $0x58] sm:$0xff]  ;;  %v63_v41 = vld [vmem:[%s1036_s4 + $0x50] sm:$0xff]  ;;  %v62_v42 = vld [vmem:[%s1036_s4 + $0x48] sm:$0xff] }
   0xc   :  { %691 = vmatmul.msk.f32.gmra.mxu3 %vm371_vm0, %v344_v3  ;;  %v61_v43 = vld [vmem:[%s1036_s4 + $0x40] sm:$0xff]  ;;  %v60_v44 = vld [vmem:[%s1036_s4 + $0x38] sm:$0xff]  ;;  %v59_v45 = vld [vmem:[%s1036_s4 + $0x30] sm:$0xff] }
   0xd   :  { %101 = vperm.xlu2 %709, %v91_v9   ;;  %161 = vmatpush.msra.mxu1 %v67_v37  ;;  %v58_v46 = vld [vmem:[%s1036_s4 + $0x28] sm:$0xff]  ;;  %v57_v47 = vld [vmem:[%s1036_s4 + $0x20] sm:$0xff]  ;;  %v56_v48 = vld [vmem:[%s1036_s4 + $0x18] sm:$0xff] }
   0xe   :  { %v55_v49 = vld [vmem:[%s1036_s4 + $0x10] sm:$0xff]  ;;  %v54_v50 = vld [vmem:[%s1036_s4 + $0x8] sm:$0xff]  ;;  %v53_v51 = vld [vmem:[%s1036_s4] sm:$0xff] }
   0xf   :  { %162 = vmatpush.msra.mxu1 %v66_v38 }
  0x11   :  { %163 = vmatpush.msra.mxu1 %v65_v39 }
  0x12   :  { %111 = vperm.xlu1 %711, %v93_v10   ;;  %106 = vperm.xlu0 %710, %v92_v11  }
  0x13   :  { %164 = vmatpush.msra.mxu1 %v64_v40 }
  0x14   :  { %692 = vmatmul.msk.f32.gmra.mxu3 %vm371_vm0, %v345_v4 }
  0x15   :  { %368 = vperm.xlu2 %709, %v350_v16   ;;  %165 = vmatpush.msra.mxu1 %v63_v41 }
  0x17   :  { %166 = vmatpush.msra.mxu1 %v62_v42 }
  0x19   :  { %167 = vmatpush.msra.mxu1 %v61_v43 }
  0x1a   :  { %363 = vperm.xlu1 %711, %v349_v17   ;;  %353 = vperm.xlu0 %710, %v347_v18  }
  0x1b   :  { %168 = vmatpush.msra.mxu1 %v60_v44 }
  0x1c   :  { %693 = vmatmul.msk.f32.gmra.mxu3 %vm371_vm0, %v346_v5  ;;  %v972_v5 = vld [vmem:[%s1037_s5] sm:$0xf]  ;;  %vm435_vm0 = vcmask 130048  }
  0x1d   :  { %358 = vperm.xlu2 %709, %v348_v25   ;;  %169 = vmatpush.msra.mxu1 %v59_v45 }
  0x1e   :  { %681 = vmatpush.msk.msra.mxu2 %vm290_vm2, %v972_v5 }
  0x1f   :  { %170 = vmatpush.msra.mxu1 %v58_v46 }
  0x20   :  { %596 = vmatpush.msrb.mxu2 %v68_v36 }
  0x21   :  { %171 = vmatpush.msra.mxu1 %v57_v47 }
  0x22   :  { %476 = vperm.xlu1 %711, %v468_v26   ;;  %432 = vperm.xlu0 %710, %v424_v27  }
  0x23   :  { %172 = vmatpush.msra.mxu1 %v56_v48  ;;  %597 = vmatpush.msrb.mxu2 %v67_v37 }
  0x25   :  { %471 = vperm.xlu2 %709, %v467_v32   ;;  %173 = vmatpush.msra.mxu1 %v55_v49 }
  0x26   :  { %598 = vmatpush.msrb.mxu2 %v66_v38 }
  0x27   :  { %174 = vmatpush.msra.mxu1 %v54_v50 }
  0x28   :  { %599 = vmatpush.msrb.mxu2 %v65_v39 }
  0x29   :  { %175 = vmatpush.msra.mxu1 %v53_v51 }
  0x2a   :  { %427 = vperm.xlu1 %711, %v423_v31   ;;  %600 = vmatpush.msrb.mxu2 %v64_v40 }
  0x2c   :  { %601 = vmatpush.msrb.mxu2 %v63_v41 }
  0x2e   :  { %602 = vmatpush.msrb.mxu2 %v62_v42 }
  0x30   :  { %603 = vmatpush.msrb.mxu2 %v61_v43 }
  0x32   :  { %604 = vmatpush.msrb.mxu2 %v60_v44 }
  0x34   :  { %605 = vmatpush.msrb.mxu2 %v59_v45 }
  0x36   :  { %606 = vmatpush.msrb.mxu2 %v58_v46 }
  0x38   :  { %607 = vmatpush.msrb.mxu2 %v57_v47 }
  0x3a   :  { %608 = vmatpush.msrb.mxu2 %v56_v48 }
  0x3c   :  { %609 = vmatpush.msrb.mxu2 %v55_v49 }
  0x3e   :  { %610 = vmatpush.msrb.mxu2 %v54_v50 }
  0x40   :  { %611 = vmatpush.msrb.mxu2 %v53_v51 }
  0x5f   :  { %v97_v52 = vpop.permute.xlu2 %96 }
  0x67   :  { %v102_v55 = vpop.permute.xlu2 %101 }
  0x74   :  { %v83_v13 = vpop.permute.xlu0 %82  ;;  %v75_v14 = vpop.permute.xlu1 %74 }
  0x75   :  { %v85_v15 = vmul.f32 %v84_v12, %v83_v13  ;;  %v77_v28 = vmul.f32 %v76_v21, %v75_v14 }
  0x77   :  { %138 = vmatpush.msra.mxu0 %v85_v15 }
  0x7c   :  { %v79_v20 = vpop.permute.xlu0 %78  ;;  %v71_v24 = vpop.permute.xlu1 %70 }
  0x7d   :  { %v81_v22 = vmul.f32 %v80_v19, %v79_v20  ;;  %v73_v29 = vmul.f32 %v72_v23, %v71_v24 }
  0x7f   :  { %139 = vmatpush.msra.mxu0 %v81_v22 }
  0x81   :  { %140 = vmatpush.msra.mxu0 %v822_v0 }
  0x83   :  { %141 = vmatpush.msra.mxu0 %v77_v28 }
  0x84   :  { %v107_v58 = vpop.permute.xlu0 %106  ;;  %v112_v61 = vpop.permute.xlu1 %111 }
  0x85   :  { %142 = vmatpush.msra.mxu0 %v73_v29 }
  0x86   :  { %677 = vmatmul.msk.f32.vlgmr.msra.gmra.mxu0 %vm114_vm1, %v86_v30 }
  0x8e   :  { %678 = vmatmul.msk.f32.gmra.mxu0 %vm114_vm1, %v87_v33 }
  0x96   :  { %679 = vmatmul.msk.f32.gmra.mxu0 %vm114_vm1, %v88_v34 }
  0x9e   :  { %680 = vmatmul.msk.f32.gmra.mxu0 %vm114_vm1, %v89_v35 }
 0x103   :  { %v144_v53 = vpop.f32.mrf.mxu0 }
 0x104   :  { %v949_v54 = vadd.f32 %v144_v53, %v97_v52 }
 0x106   :  { %176 = vmatmul.f32.vlgmr.msra.gmra.mxu1 %v949_v54  ;;  %v156_v1 = vmul.f32 %v949_v54, %v949_v54 }
 0x10b   :  { %v147_v56 = vpop.f32.mrf.mxu0 }
 0x10c   :  { %v952_v57 = vadd.f32 %v147_v56, %v102_v55 }
 0x10e   :  { %179 = vmatmul.f32.gmra.mxu1 %v952_v57  ;;  %v157_v2 = vmul.f32 %v952_v57, %v952_v57 }
 0x113   :  { %v150_v59 = vpop.f32.mrf.mxu0 }
 0x114   :  { %v955_v60 = vadd.f32 %v150_v59, %v107_v58 }
 0x116   :  { %182 = vmatmul.f32.gmra.mxu1 %v955_v60  ;;  %v158_v3 = vmul.f32 %v955_v60, %v955_v60 }
 0x11b   :  { %v153_v62 = vpop.f32.mrf.mxu0 }
 0x11c   :  { %v958_v63 = vadd.f32 %v153_v62, %v112_v61 }
 0x11e   :  { %185 = vmatmul.f32.gmra.mxu1 %v958_v63  ;;  %v159_v4 = vmul.f32 %v958_v63, %v958_v63 }
 0x126   :  { %188 = vmatmul.f32.gmra.mxu1 %v156_v1 }
 0x12e   :  { %191 = vmatmul.f32.gmra.mxu1 %v157_v2 }
 0x136   :  { %194 = vmatmul.f32.gmra.mxu1 %v158_v3 }
 0x13e   :  { %197 = vmatmul.f32.gmra.mxu1 %v159_v4 }
 0x183   :  { %v177_v6 = vpop.f32.mrf.mxu1 }
 0x184   :  { %v201_v7 = vmul.f32 0.041666668, %v177_v6 }
 0x186   :  { %682 = vmatmul.msk.f32.vlgmr.msra.gmra.mxu2 %vm265_vm3, %v201_v7  ;;  %v209_v15 = vmul.f32 %v201_v7, %v201_v7 }
 0x18b   :  { %v180_v8 = vpop.f32.mrf.mxu1 }
 0x18c   :  { %v202_v9 = vmul.f32 0.041666668, %v180_v8 }
 0x18e   :  { %683 = vmatmul.msk.f32.gmra.mxu2 %vm265_vm3, %v202_v9  ;;  %v210_v21 = vmul.f32 %v202_v9, %v202_v9 }
 0x193   :  { %v183_v10 = vpop.f32.mrf.mxu1 }
 0x194   :  { %v203_v11 = vmul.f32 0.041666668, %v183_v10 }
 0x196   :  { %684 = vmatmul.msk.f32.gmra.mxu2 %vm265_vm3, %v203_v11  ;;  %v211_v29 = vmul.f32 %v203_v11, %v203_v11  ;;  %v401_v11 = vpop.f32.mrf.mxu3 }
 0x19b   :  { %v186_v12 = vpop.f32.mrf.mxu1 }
 0x19c   :  { %v204_v13 = vmul.f32 0.041666668, %v186_v12 }
 0x19e   :  { %685 = vmatmul.msk.f32.gmra.mxu2 %vm265_vm3, %v204_v13  ;;  %v212_v41 = vmul.f32 %v204_v13, %v204_v13  ;;  %v369_v13 = vpop.permute.xlu2 %368 }
 0x1a3   :  { %v189_v14 = vpop.f32.mrf.mxu1 }
 0x1a4   :  { %v205_v16 = vmul.f32 0.041666668, %v189_v14  ;;  %v404_v14 = vpop.f32.mrf.mxu3 }
 0x1a6   :  { %v213_v17 = vsub.f32 %v205_v16, %v209_v15  ;;  %v359_v16 = vpop.permute.xlu2 %358 }
 0x1a8   :  { %v217_v18 = vmax.f32 %v213_v17, 0.0  ;;  %v405_v17 = vadd.f32 %v404_v14, %v359_v16 }
 0x1aa   :  { %v221_v19 = vadd.f32 1e-05, %v217_v18  ;;  %v354_v18 = vpop.permute.xlu0 %353 }
 0x1ab   :  { %v192_v20 = vpop.f32.mrf.mxu1 }
 0x1ac   :  { %712 = vrsqrt.f32 %v221_v19  ;;  %v206_v22 = vmul.f32 0.041666668, %v192_v20  ;;  %vm231_vm5 = vweird.f32 %v221_v19 }
 0x1ae   :  { %v214_v23 = vsub.f32 %v206_v22, %v210_v21  ;;  %v407_v22 = vpop.f32.mrf.mxu3 }
 0x1b0   :  { %v218_v24 = vmax.f32 %v214_v23, 0.0 }
 0x1b2   :  { %v713_v25 = vpop.eup %712  ;;  %v222_v26 = vadd.f32 1e-05, %v218_v24  ;;  %v414_v24 = vmax.f32 %v405_v17, 0.0 }
 0x1b3   :  { %v226_v27 = vmul.f32 %v713_v25, %v221_v19  ;;  %v195_v28 = vpop.f32.mrf.mxu1  ;;  %vm232_vm4 = vweird.f32 %v713_v25  ;;  %v402_v19 = vadd.f32 %v401_v11, %v354_v18 }
 0x1b4   :  { %714 = vrsqrt.f32 %v222_v26  ;;  %v207_v30 = vmul.f32 0.041666668, %v195_v28  ;;  %vm233_vm6 = vmor %vm231_vm5, %vm232_vm4  ;;  %vm241_vm8 = vweird.f32 %v222_v26 }
 0x1b5   :  { %v227_v31 = vmul.f32 %v713_v25, %v226_v27  ;;  %v413_v27 = vmax.f32 %v402_v19, 0.0 }
 0x1b6   :  { %v215_v32 = vsub.f32 %v207_v30, %v211_v29  ;;  %v421_v30 = vld [vmem:[%s1038_s10] sm:$0xff] }
 0x1b7   :  { %v228_v33 = vmul.f32 0.5, %v227_v31 }
 0x1b8   :  { %v219_v34 = vmax.f32 %v215_v32, 0.0  ;;  %v422_v32 = vld [vmem:[%s1038_s10 + $0x8] sm:$0xff] }
 0x1b9   :  { %v229_v35 = vsub.f32 1.5, %v228_v33  ;;  %v364_v33 = vpop.permute.xlu1 %363 }
 0x1ba   :  { %v715_v36 = vpop.eup %714  ;;  %v223_v37 = vadd.f32 1e-05, %v219_v34  ;;  %v408_v34 = vadd.f32 %v407_v22, %v364_v33 }
 0x1bb   :  { %v236_v38 = vmul.f32 %v715_v36, %v222_v26  ;;  %v198_v39 = vpop.f32.mrf.mxu1  ;;  %v230_v40 = vmul.f32 %v713_v25, %v229_v35  ;;  %vm242_vm7 = vweird.f32 %v715_v36 }
 0x1bc   :  { %716 = vrsqrt.f32 %v223_v37  ;;  %v208_v42 = vmul.f32 0.041666668, %v198_v39  ;;  %vm243_vm9 = vmor %vm241_vm8, %vm242_vm7  ;;  %vm251_vm11 = vweird.f32 %v223_v37 }
 0x1bd   :  { %v234_v43 = vsel %vm233_vm6, %v713_v25, %v230_v40  ;;  %v237_v44 = vmul.f32 %v715_v36, %v236_v38 }
 0x1be   :  { %v216_v45 = vsub.f32 %v208_v42, %v212_v41  ;;  %686 = vmatmul.msk.f32.gmra.mxu2 %vm265_vm3, %v234_v43  ;;  %v415_v41 = vmax.f32 %v408_v34, 0.0 }
 0x1bf   :  { %v238_v46 = vmul.f32 0.5, %v237_v44  ;;  %v465_v44 = vld [vmem:[%s1038_s10 + $0x10] sm:$0xff] }
 0x1c0   :  { %v220_v47 = vmax.f32 %v216_v45, 0.0 }
 0x1c1   :  { %v239_v48 = vsub.f32 1.5, %v238_v46 }
 0x1c2   :  { %v717_v49 = vpop.eup %716  ;;  %v224_v50 = vadd.f32 1e-05, %v220_v47 }
 0x1c3   :  { %v246_v51 = vmul.f32 %v717_v49, %v223_v37  ;;  %v240_v52 = vmul.f32 %v715_v36, %v239_v48  ;;  %vm252_vm10 = vweird.f32 %v717_v49  ;;  %v477_v48 = vpop.permute.xlu1 %476 }
 0x1c4   :  { %718 = vrsqrt.f32 %v224_v50  ;;  %vm253_vm12 = vmor %vm251_vm11, %vm252_vm10  ;;  %vm261_vm14 = vweird.f32 %v224_v50  ;;  %vm571_vm10 = vcmask 392192  }
 0x1c5   :  { %v244_v53 = vsel %vm243_vm9, %v715_v36, %v240_v52  ;;  %v247_v55 = vmul.f32 %v717_v49, %v246_v51 }
 0x1c6   :  { %687 = vmatmul.msk.f32.gmra.mxu2 %vm265_vm3, %v244_v53 }
 0x1c7   :  { %v248_v56 = vmul.f32 0.5, %v247_v55 }
 0x1c9   :  { %v249_v58 = vsub.f32 1.5, %v248_v56 }
 0x1ca   :  { %v719_v59 = vpop.eup %718 }
 0x1cb   :  { %v256_v61 = vmul.f32 %v719_v59, %v224_v50  ;;  %v250_v62 = vmul.f32 %v717_v49, %v249_v58  ;;  %vm262_vm13 = vweird.f32 %v719_v59  ;;  %v428_v56 = vpop.permute.xlu1 %427 }
 0x1cc   :  { %vm263_vm15 = vmor %vm261_vm14, %vm262_vm13 }
 0x1cd   :  { %v254_v1 = vsel %vm253_vm12, %v717_v49, %v250_v62  ;;  %v257_v2 = vmul.f32 %v719_v59, %v256_v61 }
 0x1ce   :  { %688 = vmatmul.msk.f32.gmra.mxu2 %vm265_vm3, %v254_v1 }
 0x1cf   :  { %v258_v3 = vmul.f32 0.5, %v257_v2 }
 0x1d1   :  { %v259_v4 = vsub.f32 1.5, %v258_v3 }
 0x1d3   :  { %v260_v6 = vmul.f32 %v719_v59, %v259_v4 }
 0x1d5   :  { %v264_v7 = vsel %vm263_vm15, %v719_v59, %v260_v6 }
 0x1d6   :  { %689 = vmatmul.msk.f32.gmra.mxu2 %vm265_vm3, %v264_v7  ;;  %v433_v7 = vpop.permute.xlu0 %432 }
 0x209   :  { %v311_v8 = vpop.f32.mrf.mxu2 }
 0x20a   :  { %v335_v20 = vsub.f32 %v949_v54, %v311_v8  ;;  %v410_v54 = vpop.f32.mrf.mxu3 }
 0x211   :  { %v314_v9 = vpop.f32.mrf.mxu2 }
 0x212   :  { %v336_v21 = vsub.f32 %v952_v57, %v314_v9  ;;  %v411_v57 = vadd.f32 %v410_v54, %v369_v13 }
 0x214   :  { %v416_v38 = vmax.f32 %v411_v57, 0.0 }
 0x219   :  { %v317_v10 = vpop.f32.mrf.mxu2 }
 0x21a   :  { %v337_v35 = vsub.f32 %v955_v60, %v317_v10  ;;  %v466_v60 = vld [vmem:[%s1038_s10 + $0x18] sm:$0xff] }
 0x221   :  { %v320_v12 = vpop.f32.mrf.mxu2 }
 0x222   :  { %v338_v36 = vsub.f32 %v958_v63, %v320_v12  ;;  %v472_v63 = vpop.permute.xlu2 %471 }
 0x241   :  { %v323_v15 = vpop.f32.mrf.mxu2 }
 0x242   :  { %v339_v25 = vmul.f32 %v335_v20, %v323_v15 }
 0x244   :  { %v417_v29 = vadd.f32 %v413_v27, %v339_v25  ;;  %v565_v25 = vld [vmem:[%s1039_s13] sm:$0xff] }
 0x249   :  { %v326_v23 = vpop.f32.mrf.mxu2 }
 0x24a   :  { %v340_v26 = vmul.f32 %v336_v21, %v326_v23 }
 0x24c   :  { %v418_v28 = vadd.f32 %v414_v24, %v340_v26 }
 0x24e   :  { %456 = vmatpush.msrb.mxu3 %v418_v28  ;;  %v52_v28 = vld [vmem:[%s1040_s3] sm:$0x7] }
 0x250   :  { %457 = vmatpush.msrb.mxu3 %v417_v29  ;;  %v561_v29 = vperm.slane %v52_v28, 2 }
 0x251   :  { %v329_v31 = vpop.f32.mrf.mxu2  ;;  %694 = vmatmul.msk.f32.vlgmr.msrb.gmra.mxu3 %vm435_vm0, %v421_v30 }
 0x252   :  { %v341_v39 = vmul.f32 %v337_v35, %v329_v31 }
 0x254   :  { %v419_v43 = vadd.f32 %v415_v41, %v341_v39 }
 0x259   :  { %v332_v37 = vpop.f32.mrf.mxu2  ;;  %695 = vmatmul.msk.f32.gmra.mxu3 %vm435_vm0, %v422_v32  ;;  %v554_v32 = vperm.slane %v52_v28, 0 }
 0x25a   :  { %v342_v40 = vmul.f32 %v338_v36, %v332_v37  ;;  %v564_v37 = vld [vmem:[%s1041_s12] sm:$0xff] }
 0x25c   :  { %v420_v42 = vadd.f32 %v416_v38, %v342_v40 }
 0x25e   :  { %499 = vmatpush.msrb.mxu0 %v420_v42 }
 0x260   :  { %500 = vmatpush.msrb.mxu0 %v419_v43 }
 0x261   :  { %696 = vmatmul.msk.f32.vlgmr.msrb.gmra.mxu0 %vm435_vm0, %v465_v44 }
 0x262   :  { %701 = vmatpush.msk.msra.mxu0 %vm290_vm2, %v972_v5 }
 0x269   :  { %697 = vmatmul.msk.f32.gmra.mxu0 %vm435_vm0, %v466_v60 }
 0x2d4   :  { %v459_v5 = vpop.f32.mrf.mxu3 }
 0x2d5   :  { %v460_v59 = vadd.f32 %v459_v5, %v428_v56 }
 0x2dc   :  { %v462_v3 = vpop.f32.mrf.mxu3 }
 0x2dd   :  { %v463_v10 = vadd.f32 %v462_v3, %v433_v7 }
 0x2de   :  { %v502_v45 = vpop.f32.mrf.mxu0 }
 0x2df   :  { %v503_v46 = vadd.f32 %v502_v45, %v472_v63 }
 0x2e1   :  { %v698_v47 = vmul.f32 -1.442695, %v503_v46 }
 0x2e3   :  { %720 = vpow2.f32 %v698_v47 }
 0x2e6   :  { %v505_v49 = vpop.f32.mrf.mxu0 }
 0x2e7   :  { %v506_v50 = vadd.f32 %v505_v49, %v477_v48 }
 0x2e9   :  { %v721_v51 = vpop.eup %720  ;;  %v699_v52 = vmul.f32 -1.442695, %v506_v50 }
 0x2ea   :  { %v516_v53 = vadd.f32 1.0, %v721_v51 }
 0x2eb   :  { %722 = vpow2.f32 %v699_v52 }
 0x2ec   :  { %724 = vrcp.f32 %v516_v53  ;;  %v529_v2 = vand.u32 2147483648, %v516_v53  ;;  %v527_v6 = vand.u32 2147483647, %v516_v53  ;;  %vm523_vm2 = vweird.f32 %v516_v53 }
 0x2ee   :  { %v530_v11 = vor.u32 1.1754944e-38, %v529_v2  ;;  %vm528_vm5 = vcmp.eq.f32.partialorder %v527_v6, 8.507059e+37 }
 0x2f1   :  { %v723_v55 = vpop.eup %722 }
 0x2f2   :  { %v725_v58 = vpop.eup %724  ;;  %v517_v61 = vadd.f32 1.0, %v723_v55 }
 0x2f3   :  { %v519_v62 = vmul.f32 %v725_v58, %v516_v53  ;;  %vm524_vm1 = vweird.f32 %v725_v58 }
 0x2f4   :  { %726 = vrcp.f32 %v517_v61  ;;  %vm525_vm4 = vmor %vm523_vm2, %vm524_vm1  ;;  %v544_v18 = vand.u32 2147483648, %v517_v61  ;;  %v542_v20 = vand.u32 2147483647, %v517_v61  ;;  %vm538_vm7 = vweird.f32 %v517_v61 }
 0x2f5   :  { %v520_v1 = vsub.f32 1.0, %v519_v62  ;;  %728 = vtanh.f32 %v460_v59 }
 0x2f6   :  { %730 = vtanh.f32 %v463_v10  ;;  %v545_v22 = vor.u32 1.1754944e-38, %v544_v18  ;;  %vm543_vm9 = vcmp.eq.f32.partialorder %v542_v20, 8.507059e+37 }
 0x2f7   :  { %v521_v4 = vmul.f32 %v725_v58, %v520_v1 }
 0x2f9   :  { %v522_v8 = vadd.f32 %v725_v58, %v521_v4 }
 0x2fa   :  { %v727_v9 = vpop.eup %726 }
 0x2fb   :  { %v534_v12 = vmul.f32 %v727_v9, %v517_v61  ;;  %v526_v13 = vsel %vm525_vm4, %v725_v58, %v522_v8  ;;  %v729_v14 = vpop.eup %728  ;;  %vm539_vm6 = vweird.f32 %v727_v9 }
 0x2fc   :  { %v531_v15 = vsel %vm528_vm5, %v530_v11, %v526_v13  ;;  %vm540_vm8 = vmor %vm538_vm7, %vm539_vm6  ;;  %v731_v24 = vpop.eup %730 }
 0x2fd   :  { %v548_v16 = vmul.f32 %v729_v14, %v531_v15  ;;  %v535_v17 = vsub.f32 1.0, %v534_v12 }
 0x2ff   :  { %557 = vrot.lane.b32.xlu0 %v548_v16, %s736_s1  ;;  %v536_v19 = vmul.f32 %v727_v9, %v535_v17 }
 0x301   :  { %v537_v21 = vadd.f32 %v727_v9, %v536_v19 }
 0x303   :  { %v541_v23 = vsel %vm540_vm8, %v727_v9, %v537_v21 }
 0x304   :  { %v546_v26 = vsel %vm543_vm9, %v545_v22, %v541_v23 }
 0x305   :  { %v549_v27 = vmul.f32 %v731_v24, %v546_v26 }
 0x307   :  { %568 = vperm.xlu0 %710, %v565_v25   ;;  %552 = vrot.lane.b32.xlu1 %v549_v27, %s735_s25 }
 0x308   :  { %559 = vrot.lane.b32.xlu2 %v549_v27, %s736_s1 }
 0x310   :  { %550 = vrot.lane.b32.xlu2 %v548_v16, %s735_s25 }
 0x362   :  { %v560_v30 = vpop.permute.xlu2 %559 }
 0x363   :  { %v563_v31 = vmul.f32 %v561_v29, %v560_v30 }
 0x365   :  { %585 = vmatpush.msra.mxu3 %v563_v31 }
 0x36a   :  { %v551_v33 = vpop.permute.xlu2 %550 }
 0x36b   :  { %v555_v36 = vmul.f32 %v554_v32, %v551_v33 }
 0x371   :  { %v558_v54 = vpop.permute.xlu0 %557 }
 0x372   :  { %v562_v57 = vmul.f32 %v561_v29, %v558_v54 }
 0x374   :  { %586 = vmatpush.msra.mxu3 %v562_v57 }
 0x376   :  { %587 = vmatpush.msra.mxu3 %v549_v27 }
 0x378   :  { %588 = vmatpush.msra.mxu3 %v548_v16 }
 0x379   :  { %v553_v34 = vpop.permute.xlu1 %552  ;;  %v569_v38 = vpop.permute.xlu0 %568 }
 0x37a   :  { %v556_v35 = vmul.f32 %v554_v32, %v553_v34 }
 0x37c   :  { %589 = vmatpush.msra.mxu3 %v556_v35 }
 0x37e   :  { %590 = vmatpush.msra.mxu3 %v555_v36 }
 0x37f   :  { %700 = vmatmul.msk.f32.vlgmr.msra.gmra.mxu3 %vm571_vm10, %v564_v37 }
 0x402   :  { %v592_v39 = vpop.f32.mrf.mxu3 }
 0x403   :  { %v593_v40 = vadd.f32 %v592_v39, %v569_v38 }
 0x405   :  { %612 = vmatmul.f32.vlgmr.msrb.gmra.mxu2 %v593_v40  ;;  %v595_v41 = vmul.f32 %v593_v40, %v593_v40 }
 0x40d   :  { %615 = vmatmul.f32.gmra.mxu2 %v595_v41 }
 0x488   :  { %v613_v42 = vpop.f32.mrf.mxu2 }
 0x489   :  { %v619_v43 = vmul.f32 0.041666668, %v613_v42 }
 0x48b   :  { %702 = vmatmul.msk.f32.vlgmr.msra.gmra.mxu0 %vm265_vm3, %v619_v43  ;;  %v621_v60 = vmul.f32 %v619_v43, %v619_v43 }
 0x490   :  { %v616_v44 = vpop.f32.mrf.mxu2 }
 0x491   :  { %v620_v63 = vmul.f32 0.041666668, %v616_v44 }
 0x493   :  { %v622_v45 = vsub.f32 %v620_v63, %v621_v60 }
 0x495   :  { %v623_v46 = vmax.f32 %v622_v45, 0.0 }
 0x497   :  { %v624_v47 = vadd.f32 1e-05, %v623_v46 }
 0x499   :  { %732 = vrsqrt.f32 %v624_v47  ;;  %vm631_vm12 = vweird.f32 %v624_v47 }
 0x49f   :  { %v733_v48 = vpop.eup %732 }
 0x4a0   :  { %v626_v49 = vmul.f32 %v733_v48, %v624_v47  ;;  %vm632_vm11 = vweird.f32 %v733_v48 }
 0x4a1   :  { %vm633_vm13 = vmor %vm631_vm12, %vm632_vm11 }
 0x4a2   :  { %v627_v50 = vmul.f32 %v733_v48, %v626_v49 }
 0x4a4   :  { %v628_v51 = vmul.f32 0.5, %v627_v50 }
 0x4a6   :  { %v629_v52 = vsub.f32 1.5, %v628_v51 }
 0x4a8   :  { %v630_v53 = vmul.f32 %v733_v48, %v629_v52 }
 0x4aa   :  { %v634_v5 = vsel %vm633_vm13, %v733_v48, %v630_v53 }
 0x4ab   :  { %703 = vmatmul.msk.f32.gmra.mxu0 %vm265_vm3, %v634_v5 }
 0x508   :  { %v658_v55 = vpop.f32.mrf.mxu0 }
 0x509   :  { %v664_v56 = vsub.f32 %v593_v40, %v658_v55 }
 0x528   :  { %v661_v58 = vpop.f32.mrf.mxu0 }
 0x529   :  { %v665_v59 = vmul.f32 %v664_v56, %v661_v58 }
 0x52b   :  { %666 = vst [vmem:[%s1042_s15] sm:$0xff] %v665_v59  ;;  %v667_v61 = vadd.f32 %v665_v59, %v822_v0 }
 0x52d   :  { %668 = vst [vmem:[%s1043_s14] sm:$0xff] %v667_v61 }

</bundles_post_ra>
